<compile_context>
chip_gen: v7x
topology: tpu7x:2x2x1
jax: 0.10.0
libtpu: 0.0.40
codegen_flags: <defaults>
</compile_context>

<pallas_src>
import functools

import jax
import jax.numpy as jnp
import numpy as np
from jax.experimental import pallas as pl
from jax.experimental.pallas import tpu as pltpu

LANE = 128
MAX_BLOCK_ROWS = 4096      # (4096, 128) f32 = 2 MiB per stream per pipeline buffer
PAD_LOGIT = -1e4           # sigmoid(-1e4) == 0.0 exactly in f32 (finite, no NaN risk)


def _sublane_multiple(dtype):
    # Required second-minor tile multiple: 8 for 32-bit, 16 for 16-bit, 32 for 8-bit.
    bits = jnp.dtype(dtype).itemsize * 8
    return max(8, 256 // bits)


def _round_up(x, m):
    return ((x + m - 1) // m) * m


def _focal_tversky_kernel(x_ref, t_ref, out_ref,
                          st_acc, s_acc, t_acc,
                          *, alpha, beta, gamma, smooth):
    i = pl.program_id(0)

    @pl.when(i == 0)
    def _init():
        st_acc[...] = jnp.zeros_like(st_acc)
        s_acc[...] = jnp.zeros_like(s_acc)
        t_acc[...] = jnp.zeros_like(t_acc)

    # Cast in-kernel (inputs travel over HBM in their native dtype).
    s = jax.nn.sigmoid(x_ref[...].astype(jnp.float32))
    t = t_ref[...].astype(jnp.float32)

    # Lane-wide (1, 128) partial sums, f32 accumulation.  Only one vector
    # multiply per element; fn/fp are derived at finalize.
    st_acc[...] += jnp.sum(s * t, axis=0, keepdims=True)
    s_acc[...] += jnp.sum(s, axis=0, keepdims=True)
    t_acc[...] += jnp.sum(t, axis=0, keepdims=True)

    @pl.when(i == pl.num_programs(0) - 1)
    def _finalize():
        tp = jnp.sum(st_acc[...], axis=-1, keepdims=True)       # (1, 1)
        sum_s = jnp.sum(s_acc[...], axis=-1, keepdims=True)
        sum_t = jnp.sum(t_acc[...], axis=-1, keepdims=True)
        fn = sum_t - tp                                          # sum t*(1-s)
        fp = sum_s - tp                                          # sum (1-t)*s
        tversky = (tp + smooth) / (tp + alpha * fn + beta * fp + smooth)
        out_ref[...] = jnp.power(1.0 - tversky, gamma)


def focal_tversky_loss(inputs, targets, *, alpha=0.7, beta=0.3, gamma=0.75,
                       smooth=1.0):
    x = inputs.reshape(-1)          # keep native dtype; cast happens in-kernel
    t = targets.reshape(-1)
    n = x.shape[0]

    sub = max(_sublane_multiple(x.dtype), _sublane_multiple(t.dtype))
    rows_needed = pl.cdiv(n, LANE)
    block_rows = min(MAX_BLOCK_ROWS, _round_up(max(rows_needed, 1), sub))
    num_blocks = max(1, pl.cdiv(rows_needed, block_rows))
    padded_rows = num_blocks * block_rows
    padded = padded_rows * LANE

    if padded != n:
        # Ragged tail: pad logits with a large negative value (sigmoid -> 0)
        # and targets with 0 so padded elements contribute 0 to every sum.
        # No separate mask stream, no full-array rewrite in the aligned case.
        x = jnp.pad(x, (0, padded - n), constant_values=PAD_LOGIT)
        t = jnp.pad(t, (0, padded - n), constant_values=0)

    x2 = x.reshape(padded_rows, LANE)
    t2 = t.reshape(padded_rows, LANE)

    kernel = functools.partial(_focal_tversky_kernel,
                               alpha=float(alpha), beta=float(beta),
                               gamma=float(gamma), smooth=float(smooth))

    block = pl.BlockSpec((block_rows, LANE), lambda i: (i, 0))
    out = pl.pallas_call(
        kernel,
        out_shape=jax.ShapeDtypeStruct((1, 1), jnp.float32),
        grid_spec=pltpu.PrefetchScalarGridSpec(
            num_scalar_prefetch=0,
            grid=(num_blocks,),
            in_specs=[block, block],
            out_specs=pl.BlockSpec((1, 1), lambda i: (0, 0)),
            scratch_shapes=[pltpu.VMEM((1, LANE), jnp.float32),
                            pltpu.VMEM((1, LANE), jnp.float32),
                            pltpu.VMEM((1, LANE), jnp.float32)],
        ),
        compiler_params=pltpu.CompilerParams(
            dimension_semantics=("arbitrary",),
            vmem_limit_bytes=32 * 1024 * 1024),
        # TODO(synk): on v7x (2 TCs/chip) a 2-D ("parallel","arbitrary") grid with
        # per-core partial accumulators could give up to ~2x; not gated here.
    )(x2, t2)
    return out[0, 0]


def _reference(inputs, targets, alpha=0.7, beta=0.3, gamma=0.75, smooth=1.0):
    s = jax.nn.sigmoid(inputs.astype(jnp.float32)).reshape(-1)
    t = targets.astype(jnp.float32).reshape(-1)
    tp = jnp.sum(s * t)
    fn = jnp.sum(t * (1.0 - s))
    fp = jnp.sum((1.0 - t) * s)
    tversky = (tp + smooth) / (tp + alpha * fn + beta * fp + smooth)
    return (1.0 - tversky) ** gamma


if __name__ == "__main__":
    key = jax.random.PRNGKey(0)
    k1, k2, k3, k4 = jax.random.split(key, 4)

    # Module forward implies logits + binary mask of the same shape (NCHW).
    x = jax.random.normal(k1, (2, 4, 16, 16), dtype=jnp.float32)
    targets = (jax.random.uniform(k2, (2, 4, 16, 16)) > 0.5).astype(jnp.float32)

    loss = focal_tversky_loss(x, targets)
    loss = jax.block_until_ready(loss)
    ref = _reference(x, targets)
    np.testing.assert_allclose(np.asarray(loss), np.asarray(ref),
                               rtol=1e-5, atol=1e-6)

    # Non-lane-aligned shape: exercises the negative-logit padding path.
    x_odd = jax.random.normal(k3, (1, 3, 7, 9), dtype=jnp.float32)
    t_odd = (jax.random.uniform(k4, (1, 3, 7, 9)) > 0.5).astype(jnp.float32)
    loss_odd = jax.block_until_ready(focal_tversky_loss(x_odd, t_odd))
    ref_odd = _reference(x_odd, t_odd)
    np.testing.assert_allclose(np.asarray(loss_odd), np.asarray(ref_odd),
                               rtol=1e-5, atol=1e-6)

    print("KERNEL_OK")
</pallas_src>

<mosaic_0001>
module attributes {stable_mosaic.version = 11 : i64} {
  func.func @_focal_tversky_kernel(%arg0: i32, %arg1: memref<16x128xf32, #tpu.memory_space<vmem>>, %arg2: memref<16x128xf32, #tpu.memory_space<vmem>>, %arg3: memref<1x1xf32, #tpu.memory_space<vmem>>, %arg4: memref<1x128xf32, #tpu.memory_space<vmem>>, %arg5: memref<1x128xf32, #tpu.memory_space<vmem>>, %arg6: memref<1x128xf32, #tpu.memory_space<vmem>>) attributes {dimension_semantics = [#tpu.dimension_semantics<arbitrary>], iteration_bounds = array<i64: 1>, scalar_prefetch = 0 : i64, scratch_operands = 3 : i64, tpu.core_type = #tpu.core_type<tc>, window_params = [{transform_indices = @transform_0, window_bounds = array<i64: 16, 128>}, {transform_indices = @transform_1, window_bounds = array<i64: 16, 128>}, {pipeline_mode = #tpu.pipeline_mode<synchronous>, transform_indices = @transform_2, window_bounds = array<i64: 1, 1>}]} {
    %c0_i32 = arith.constant 0 : i32
    %0 = arith.cmpi eq, %arg0, %c0_i32 : i32
    %1 = arith.extui %0 : i1 to i32
    %c0_i32_0 = arith.constant 0 : i32
    %2 = arith.cmpi ne, %1, %c0_i32_0 : i32
    scf.if %2 {
      %cst_21 = arith.constant 0.000000e+00 : f32
      %29 = vector.broadcast %cst_21 : f32 to vector<1x128xf32>
      %c0_22 = arith.constant 0 : index
      %c0_23 = arith.constant 0 : index
      %30 = vector.load %arg4[%c0_22, %c0_23] : memref<1x128xf32, #tpu.memory_space<vmem>>, vector<1x128xf32>
      tpu.vector_store %arg4[%c0_22, %c0_23], %29 {strides = array<i32>} : memref<1x128xf32, #tpu.memory_space<vmem>>, vector<1x128xf32>,
      %cst_24 = arith.constant 0.000000e+00 : f32
      %31 = vector.broadcast %cst_24 : f32 to vector<1x128xf32>
      %c0_25 = arith.constant 0 : index
      %c0_26 = arith.constant 0 : index
      %32 = vector.load %arg5[%c0_25, %c0_26] : memref<1x128xf32, #tpu.memory_space<vmem>>, vector<1x128xf32>
      tpu.vector_store %arg5[%c0_25, %c0_26], %31 {strides = array<i32>} : memref<1x128xf32, #tpu.memory_space<vmem>>, vector<1x128xf32>,
      %cst_27 = arith.constant 0.000000e+00 : f32
      %33 = vector.broadcast %cst_27 : f32 to vector<1x128xf32>
      %c0_28 = arith.constant 0 : index
      %c0_29 = arith.constant 0 : index
      %34 = vector.load %arg6[%c0_28, %c0_29] : memref<1x128xf32, #tpu.memory_space<vmem>>, vector<1x128xf32>
      tpu.vector_store %arg6[%c0_28, %c0_29], %33 {strides = array<i32>} : memref<1x128xf32, #tpu.memory_space<vmem>>, vector<1x128xf32>,
    } else {
    }
    %c0 = arith.constant 0 : index
    %c0_1 = arith.constant 0 : index
    %3 = vector.load %arg1[%c0, %c0_1] : memref<16x128xf32, #tpu.memory_space<vmem>>, vector<16x128xf32>
    %4 = arith.negf %3 : vector<16x128xf32>
    %5 = math.exp %4 : vector<16x128xf32>
    %cst = arith.constant 1.000000e+00 : f32
    %6 = vector.broadcast %cst : f32 to vector<16x128xf32>
    %7 = arith.addf %6, %5 : vector<16x128xf32>
    %8 = arith.divf %6, %7 : vector<16x128xf32>
    %c0_2 = arith.constant 0 : index
    %c0_3 = arith.constant 0 : index
    %9 = vector.load %arg2[%c0_2, %c0_3] : memref<16x128xf32, #tpu.memory_space<vmem>>, vector<16x128xf32>
    %c0_4 = arith.constant 0 : index
    %c0_5 = arith.constant 0 : index
    %10 = vector.load %arg4[%c0_4, %c0_5] : memref<1x128xf32, #tpu.memory_space<vmem>>, vector<1x128xf32>
    %11 = arith.mulf %8, %9 : vector<16x128xf32>
    %cst_6 = arith.constant dense<0.000000e+00> : vector<128xf32>
    %12 = vector.multi_reduction <add>, %11, %cst_6 [0] : vector<16x128xf32> to vector<128xf32>
    %13 = vector.shape_cast %12 : vector<128xf32> to vector<1x128xf32>
    %14 = arith.addf %10, %13 : vector<1x128xf32>
    %c0_7 = arith.constant 0 : index
    %c0_8 = arith.constant 0 : index
    %15 = vector.load %arg4[%c0_7, %c0_8] : memref<1x128xf32, #tpu.memory_space<vmem>>, vector<1x128xf32>
    tpu.vector_store %arg4[%c0_7, %c0_8], %14 {strides = array<i32>} : memref<1x128xf32, #tpu.memory_space<vmem>>, vector<1x128xf32>,
    %c0_9 = arith.constant 0 : index
    %c0_10 = arith.constant 0 : index
    %16 = vector.load %arg5[%c0_9, %c0_10] : memref<1x128xf32, #tpu.memory_space<vmem>>, vector<1x128xf32>
    %cst_11 = arith.constant dense<0.000000e+00> : vector<128xf32>
    %17 = vector.multi_reduction <add>, %8, %cst_11 [0] : vector<16x128xf32> to vector<128xf32>
    %18 = vector.shape_cast %17 : vector<128xf32> to vector<1x128xf32>
    %19 = arith.addf %16, %18 : vector<1x128xf32>
    %c0_12 = arith.constant 0 : index
    %c0_13 = arith.constant 0 : index
    %20 = vector.load %arg5[%c0_12, %c0_13] : memref<1x128xf32, #tpu.memory_space<vmem>>, vector<1x128xf32>
    tpu.vector_store %arg5[%c0_12, %c0_13], %19 {strides = array<i32>} : memref<1x128xf32, #tpu.memory_space<vmem>>, vector<1x128xf32>,
    %c0_14 = arith.constant 0 : index
    %c0_15 = arith.constant 0 : index
    %21 = vector.load %arg6[%c0_14, %c0_15] : memref<1x128xf32, #tpu.memory_space<vmem>>, vector<1x128xf32>
    %cst_16 = arith.constant dense<0.000000e+00> : vector<128xf32>
    %22 = vector.multi_reduction <add>, %9, %cst_16 [0] : vector<16x128xf32> to vector<128xf32>
    %23 = vector.shape_cast %22 : vector<128xf32> to vector<1x128xf32>
    %24 = arith.addf %21, %23 : vector<1x128xf32>
    %c0_17 = arith.constant 0 : index
    %c0_18 = arith.constant 0 : index
    %25 = vector.load %arg6[%c0_17, %c0_18] : memref<1x128xf32, #tpu.memory_space<vmem>>, vector<1x128xf32>
    tpu.vector_store %arg6[%c0_17, %c0_18], %24 {strides = array<i32>} : memref<1x128xf32, #tpu.memory_space<vmem>>, vector<1x128xf32>,
    %c0_i32_19 = arith.constant 0 : i32
    %26 = arith.cmpi eq, %arg0, %c0_i32_19 : i32
    %27 = arith.extui %26 : i1 to i32
    %c0_i32_20 = arith.constant 0 : i32
    %28 = arith.cmpi ne, %27, %c0_i32_20 : i32
    scf.if %28 {
      %c0_21 = arith.constant 0 : index
      %c0_22 = arith.constant 0 : index
      %29 = vector.load %arg4[%c0_21, %c0_22] : memref<1x128xf32, #tpu.memory_space<vmem>>, vector<1x128xf32>
      %cst_23 = arith.constant dense<0.000000e+00> : vector<1xf32>
      %30 = vector.multi_reduction <add>, %29, %cst_23 [1] : vector<1x128xf32> to vector<1xf32>
      %31 = vector.shape_cast %30 : vector<1xf32> to vector<1x1xf32>
      %c0_24 = arith.constant 0 : index
      %c0_25 = arith.constant 0 : index
      %32 = vector.load %arg5[%c0_24, %c0_25] : memref<1x128xf32, #tpu.memory_space<vmem>>, vector<1x128xf32>
      %cst_26 = arith.constant dense<0.000000e+00> : vector<1xf32>
      %33 = vector.multi_reduction <add>, %32, %cst_26 [1] : vector<1x128xf32> to vector<1xf32>
      %34 = vector.shape_cast %33 : vector<1xf32> to vector<1x1xf32>
      %c0_27 = arith.constant 0 : index
      %c0_28 = arith.constant 0 : index
      %35 = vector.load %arg6[%c0_27, %c0_28] : memref<1x128xf32, #tpu.memory_space<vmem>>, vector<1x128xf32>
      %cst_29 = arith.constant dense<0.000000e+00> : vector<1xf32>
      %36 = vector.multi_reduction <add>, %35, %cst_29 [1] : vector<1x128xf32> to vector<1xf32>
      %37 = vector.shape_cast %36 : vector<1xf32> to vector<1x1xf32>
      %38 = arith.subf %37, %31 : vector<1x1xf32>
      %39 = arith.subf %34, %31 : vector<1x1xf32>
      %cst_30 = arith.constant 1.000000e+00 : f32
      %40 = vector.broadcast %cst_30 : f32 to vector<1x1xf32>
      %41 = arith.addf %31, %40 : vector<1x1xf32>
      %cst_31 = arith.constant 0.699999988 : f32
      %42 = vector.broadcast %cst_31 : f32 to vector<1x1xf32>
      %43 = arith.mulf %42, %38 : vector<1x1xf32>
      %44 = arith.addf %31, %43 : vector<1x1xf32>
      %cst_32 = arith.constant 3.000000e-01 : f32
      %45 = vector.broadcast %cst_32 : f32 to vector<1x1xf32>
      %46 = arith.mulf %45, %39 : vector<1x1xf32>
      %47 = arith.addf %44, %46 : vector<1x1xf32>
      %cst_33 = arith.constant 1.000000e+00 : f32
      %48 = vector.broadcast %cst_33 : f32 to vector<1x1xf32>
      %49 = arith.addf %47, %48 : vector<1x1xf32>
      %50 = arith.divf %41, %49 : vector<1x1xf32>
      %cst_34 = arith.constant 1.000000e+00 : f32
      %51 = vector.broadcast %cst_34 : f32 to vector<1x1xf32>
      %52 = arith.subf %51, %50 : vector<1x1xf32>
      %cst_35 = arith.constant 7.500000e-01 : f32
      %53 = vector.broadcast %cst_35 : f32 to vector<1x1xf32>
      %54 = math.powf %52, %53 : vector<1x1xf32>
      %c0_36 = arith.constant 0 : index
      %c0_37 = arith.constant 0 : index
      %55 = vector.load %arg3[%c0_36, %c0_37] : memref<1x1xf32, #tpu.memory_space<vmem>>, vector<1x1xf32>
      tpu.vector_store %arg3[%c0_36, %c0_37], %54 {strides = array<i32>} : memref<1x1xf32, #tpu.memory_space<vmem>>, vector<1x1xf32>,
    } else {
    }
    return
  }
  func.func @transform_0(%arg0: i32) -> (i32, i32) {
    %c0_i32 = arith.constant 0 : i32
    %c0_i32_0 = arith.constant 0 : i32
    return %arg0, %c0_i32 : i32, i32
  }
  func.func @transform_1(%arg0: i32) -> (i32, i32) {
    %c0_i32 = arith.constant 0 : i32
    %c0_i32_0 = arith.constant 0 : i32
    return %arg0, %c0_i32 : i32, i32
  }
  func.func @transform_2(%arg0: i32) -> (i32, i32) {
    %c0_i32 = arith.constant 0 : i32
    %c0_i32_0 = arith.constant 0 : i32
    %c0_i32_1 = arith.constant 0 : i32
    return %c0_i32, %c0_i32_0 : i32, i32
  }
}

</mosaic_0001>

<bundles_post_ra>
// kernel: tpu_custom_call.1
= control target key start
LH: loop header
LB: loop body
LE: loop exit
PB: predicated region body
PF: predicated region fallthrough
CT: control target
= control target key end

     0   :  { %7 = vsyncpa [#allocation6], 0  ;;  %s308_s0 = inlined_call_operand.hbm [shape: f32[16,128], index: 0, kind: input, shape index: {}]   ;;  %s309_s1 = inlined_call_operand.hbm [shape: f32[16,128], index: 1, kind: input, shape index: {}]   ;;  %s310_s2 = inlined_call_operand.hbm [shape: f32[1,1], index: 2, kind: output, shape index: {}]  }
   0x1   :  { %8 = vsyncpa [#allocation9], 0 }
   0x2   :  { %9 = vsyncpa [#allocation7], 0  ;;  %s251_s9 = smov [#allocation5]   ;;  %s179_s13 = scalar_lea.hbm %s308_s0, 256 }
   0x3   :  { %s15_s10 = sshll.u32 %s251_s9, 4  ;;  %p180_p0 = scmp.ne.s32.totalorder %s308_s0, %s179_s13  ;;  %s16_s10 = int_to_ptr.vmem [resolvable:$true] %s15_s10 }
   0x4   :  { %p183_p1 = scmp.lt.u32.totalorder %s179_s13, %s308_s0 }
   0x6   :  { %p185_p2 = pnand %p183_p1, %p180_p0 }
   0x8   :  { %188 = shalt.err (!%p185_p2)
}
   0x9   :  { %s189_s18 = scalar_lea.vmem %s16_s10, 256  ;;  %p194_p4 = scmp.lt.s32.totalorder %s16_s10, %s16_s10 }
   0xa   :  { %p190_p3 = scmp.ne.s32.totalorder %s16_s10, %s189_s18  ;;  %p195_p5 = scmp.lt.s32.totalorder %s189_s18, %s189_s18 }
   0xc   :  { %p196_p6 = por %p195_p5, %p194_p4 }
   0xe   :  { %p197_p7 = pnand %p196_p6, %p190_p3 }
  0x10   :  { %200 = shalt.err (!%p197_p7)
}
  0x11   :  { %s252_s19 = smov 128   ;;  %s253_s20 = smov 8  }
  0x12   :  { %21 = dma.hbm_to_vmem [thread:$0]  %s308_s0, 256, %s16_s10, [#allocation6], %s252_s19, %s252_s19, %s253_s20  }
  0x13   :  { %s254_s23 = smov [#allocation8]   ;;  %s201_s27 = scalar_lea.hbm %s309_s1, 256 }
  0x14   :  { %s27_s24 = sshll.u32 %s254_s23, 4  ;;  %p202_p8 = scmp.ne.s32.totalorder %s309_s1, %s201_s27  ;;  %s28_s24 = int_to_ptr.vmem [resolvable:$true] %s27_s24 }
  0x15   :  { %p205_p9 = scmp.lt.u32.totalorder %s201_s27, %s309_s1 }
  0x17   :  { %p207_p10 = pnand %p205_p9, %p202_p8 }
  0x19   :  { %210 = shalt.err (!%p207_p10)
}
  0x1a   :  { %s211_s4 = scalar_lea.vmem %s28_s24, 256  ;;  %p216_p12 = scmp.lt.s32.totalorder %s28_s24, %s28_s24 }
  0x1b   :  { %p212_p11 = scmp.ne.s32.totalorder %s28_s24, %s211_s4  ;;  %p217_p13 = scmp.lt.s32.totalorder %s211_s4, %s211_s4 }
  0x1d   :  { %p218_p0 = por %p217_p13, %p216_p12 }
  0x1f   :  { %p219_p1 = pnand %p218_p0, %p212_p11 }
  0x21   :  { %222 = shalt.err (!%p219_p1)
}
  0x22   :  { %33 = dma.hbm_to_vmem [thread:$0]  %s309_s1, 256, %s28_s24, [#allocation9], %s252_s19, %s252_s19, %s253_s20  }
  0x23   :  { %245 = dma.done.wait [#allocation6], 256  }
  0x24   :  { %246 = vsyncadd [#allocation6], 4294967040 }
  0x25   :  { %247 = dma.done.wait [#allocation9], 256  }
  0x26   :  { %248 = vsyncadd [#allocation9], 4294967040  ;;  %v255_v0 = vmov 0.0   ;;  %v47_v1 = vld [vmem:[#allocation5] sm:$0xff]  ;;  %v48_v2 = vld [vmem:[#allocation5 + $0x8] sm:$0xff]  ;;  %vm99_vm0 = vcmask 1040384  }
  0x27   :  { %45 = vst [vmem:[#allocation3] sm:$0x1] %v255_v0  ;;  %44 = vst [vmem:[#allocation2] sm:$0x1] %v255_v0  ;;  %v141_v3 = vmul.f32 -1.442695, %v47_v1 }
  0x28   :  { %46 = vst [vmem:[#allocation4] sm:$0x1] %v255_v0  ;;  %v142_v4 = vmul.f32 -1.442695, %v48_v2  ;;  %v61_v5 = vld [vmem:[#allocation8] sm:$0xff]  ;;  %v62_v6 = vld [vmem:[#allocation8 + $0x8] sm:$0xff] }
  0x29   :  { %165 = vpow2.f32 %v141_v3  ;;  %v86_v7 = vadd.f32 %v62_v6, %v61_v5  ;;  %s256_s1 = smov [#allocation10]   ;;  %vm123_vm4 = vcmask 0  }
  0x2a   :  { %167 = vpow2.f32 %v142_v4  ;;  %s131_s6 = sshll.u32 %s256_s1, 4  ;;  %s132_s6 = int_to_ptr.vmem [resolvable:$true] %s131_s6 }
  0x2b   :  { %v87_v8 = vrot.slane %v86_v7, 4  ;;  %s223_s7 = scalar_lea.vmem %s132_s6, 16  ;;  %s227_s8 = scalar_lea.vmem %s132_s6, 32 }
  0x2c   :  { %p224_p2 = scmp.ne.s32.totalorder %s132_s6, %s223_s7  ;;  %p228_p3 = scmp.lt.s32.totalorder %s132_s6, %s132_s6 }
  0x2d   :  { %v88_v9 = vadd.f32 %v87_v8, %v86_v7  ;;  %p229_p4 = scmp.lt.s32.totalorder %s227_s8, %s223_s7 }
  0x2e   :  { %v75_v35 = vld [vmem:[#allocation3] sm:$0x1]  ;;  %v63_v38 = vld [vmem:[#allocation2] sm:$0x1] }
  0x2f   :  { %v89_v10 = vrot.slane %v88_v9, 2  ;;  %v85_v16 = vld [vmem:[#allocation4] sm:$0x1]  ;;  %p230_p5 = por %p229_p4, %p228_p3 }
  0x31   :  { %v90_v11 = vadd.f32 %v89_v10, %v88_v9  ;;  %p231_p6 = pnand %p230_p5, %p224_p2 }
  0x33   :  { %v166_v12 = vpop.eup %165  ;;  %v91_v13 = vrot.slane %v90_v11, 1 }
  0x34   :  { %v168_v14 = vpop.eup %167  ;;  %v55_v15 = vadd.f32 1.0, %v166_v12 }
  0x35   :  { %v56_v17 = vadd.f32 1.0, %v168_v14  ;;  %v92_v18 = vadd.f32 %v91_v13, %v90_v11 }
  0x36   :  { %169 = vrcp.f32 %v55_v15 }
  0x37   :  { %171 = vrcp.f32 %v56_v17  ;;  %v93_v19 = vadd.f32 %v92_v18, %v85_v16 }
  0x39   :  { %94 = vst [vmem:[#allocation4] sm:$0x1] %v93_v19 }
  0x40   :  { %v170_v20 = vpop.eup %169  ;;  %v107_v45 = vld [vmem:[#allocation4] sm:$0x1] }
  0x41   :  { %v172_v21 = vpop.eup %171  ;;  %v64_v22 = vmul.f32 %v170_v20, %v61_v5  ;;  %v108_v47 = vsel %vm99_vm0, %v107_v45, 0.0 }
  0x42   :  { %v76_v23 = vadd.f32 %v172_v21, %v170_v20  ;;  %v65_v24 = vmul.f32 %v172_v21, %v62_v6 }
  0x44   :  { %v77_v25 = vrot.slane %v76_v23, 4  ;;  %v66_v26 = vadd.f32 %v65_v24, %v64_v22 }
  0x46   :  { %v78_v27 = vadd.f32 %v77_v25, %v76_v23  ;;  %v67_v28 = vrot.slane %v66_v26, 4 }
  0x48   :  { %v79_v29 = vrot.slane %v78_v27, 2  ;;  %v68_v30 = vadd.f32 %v67_v28, %v66_v26 }
  0x4a   :  { %v80_v31 = vadd.f32 %v79_v29, %v78_v27  ;;  %v69_v32 = vrot.slane %v68_v30, 2 }
  0x4c   :  { %v81_v33 = vrot.slane %v80_v31, 1  ;;  %v70_v34 = vadd.f32 %v69_v32, %v68_v30 }
  0x4e   :  { %v82_v36 = vadd.f32 %v81_v33, %v80_v31  ;;  %v71_v37 = vrot.slane %v70_v34, 1 }
  0x50   :  { %v83_v39 = vadd.f32 %v82_v36, %v75_v35  ;;  %v72_v40 = vadd.f32 %v71_v37, %v70_v34 }
  0x52   :  { %84 = vst [vmem:[#allocation3] sm:$0x1] %v83_v39  ;;  %v73_v41 = vadd.f32 %v72_v40, %v63_v38 }
  0x54   :  { %74 = vst [vmem:[#allocation2] sm:$0x1] %v73_v41 }
  0x59   :  { %v103_v42 = vld [vmem:[#allocation3] sm:$0x1] }
  0x5a   :  { %v104_v43 = vsel %vm99_vm0, %v103_v42, 0.0 }
  0x5b   :  { %105 = vadd.xlane.f32.xlu1 %v104_v43  ;;  %v98_v44 = vld [vmem:[#allocation2] sm:$0x1] }
  0x5c   :  { %v100_v46 = vsel %vm99_vm0, %v98_v44, 0.0 }
  0x5d   :  { %101 = vadd.xlane.f32.xlu0 %v100_v46 }
  0x61   :  { %109 = vadd.xlane.f32.xlu0 %v108_v47 }
  0xe8   :  { %v106_v49 = vpop.xlane.xlu1 %105 }
  0xea   :  { %v102_v48 = vpop.xlane.xlu0 %101 }
  0xeb   :  { %v112_v51 = vsub.f32 %v106_v49, %v102_v48  ;;  %v113_v58 = vadd.f32 1.0, %v102_v48 }
  0xed   :  { %v116_v54 = vmul.f32 0.3, %v112_v51 }
  0xee   :  { %v110_v50 = vpop.xlane.xlu0 %109 }
  0xef   :  { %v111_v52 = vsub.f32 %v110_v50, %v102_v48 }
  0xf1   :  { %v114_v53 = vmul.f32 0.7, %v111_v52 }
  0xf3   :  { %v115_v55 = vadd.f32 %v114_v53, %v102_v48 }
  0xf5   :  { %v117_v56 = vadd.f32 %v116_v54, %v115_v55 }
  0xf7   :  { %v118_v57 = vadd.f32 1.0, %v117_v56 }
  0xf9   :  { %173 = vrcp.f32 %v118_v57 }
 0x103   :  { %v174_v59 = vpop.eup %173 }
 0x104   :  { %v120_v60 = vmul.f32 %v174_v59, %v113_v58 }
 0x106   :  { %v121_v61 = vsub.f32 1.0, %v120_v60 }
 0x108   :  { %175 = vrsqrt.f32 %v121_v61  ;;  %vm149_vm1 = vcmp.eq.f32.partialorder %v121_v61, inf  ;;  %v152_v0 = vand.u32 2147483648, %v121_v61  ;;  %vm143_vm2 = vcmp.eq.f32.partialorder %v121_v61, 0.0 }
 0x109   :  { %v145_v4 = vand.u32 2147483647, %v121_v61  ;;  %vm144_vm3 = vcmp.lt.f32.partialorder %v121_v61, 0.0 }
 0x10b   :  { %vm146_vm5 = vcmp.eq.f32.partialorder %v145_v4, inf }
 0x112   :  { %v176_v62 = vpop.eup %175 }
 0x113   :  { %v148_v63 = vmul.f32 %v176_v62, %v121_v61 }
 0x115   :  { %v150_v1 = vsel %vm149_vm1, %v121_v61, %v148_v63 }
 0x116   :  { %v153_v2 = vsel %vm143_vm2, %v152_v0, %v150_v1 }
 0x117   :  { %177 = vrsqrt.f32 %v153_v2 }
 0x121   :  { %v178_v3 = vpop.eup %177 }
 0x122   :  { %v155_v5 = vmul.f32 %v178_v3, %v121_v61 }
 0x124   :  { %v156_v6 = vsel %vm144_vm3, nan, %v155_v5 }
 0x125   :  { %v157_v7 = vsel %vm143_vm2, 0.0, %v156_v6 }
 0x126   :  { %v158_v8 = vsel %vm146_vm5, inf, %v157_v7 }
 0x127   :  { %124 = vst.msk [vmem:[#allocation10] sm:$0x1] %vm123_vm4, %v158_v8 }
 0x128   :  { %234 = shalt.err (!%p231_p6)
}
 0x129   :  { %s235_s11 = scalar_lea.hbm %s310_s2, 16 }
 0x12a   :  { %p236_p7 = scmp.ne.s32.totalorder %s310_s2, %s235_s11  ;;  %p239_p8 = scmp.lt.u32.totalorder %s235_s11, %s310_s2 }
 0x12c   :  { %p241_p9 = pnand %p239_p8, %p236_p7 }
 0x12e   :  { %244 = shalt.err (!%p241_p9)
}
 0x12f   :  { %134 = dma.vmem_to_hbm [thread:$0]  %s132_s6, 16, %s310_s2, [#allocation7]  }
 0x130   :  { %249 = dma.done.wait [#allocation7], 16  }
 0x131   :  { %250 = vsyncadd [#allocation7], 4294967280 }
 0x132   :  { %138 = vsyncpa [#allocation6], 1 }
 0x133   :  { %139 = vsyncpa [#allocation9], 1 }
 0x134   :  { %140 = vsyncpa [#allocation7], 1 }

</bundles_post_ra>
